<compile_context>
chip_gen: v6e
topology: v6e:2x2x1
jax: 0.10.0
libtpu: 0.0.40
codegen_flags: <defaults>
</compile_context>

<pallas_src>
import jax
import jax.numpy as jnp
from jax.experimental import pallas as pl
from jax.experimental.pallas import tpu as pltpu

LANE = 128


def _round_up(a: int, m: int) -> int:
    return (a + m - 1) // m * m


def mlp_kernel(x_ref, r_ref, t_ref, c_ref, o_ref):
    # x_ref/o_ref: (tile_rows, 128) f32 VMEM, batch on the lane axis.
    # r_ref/t_ref: (10,) f32 SMEM; c_ref: (2,) f32 SMEM (c[0]=C0, c[1]=C1).
    x = x_ref[...]
    acc = x * c_ref[1] + c_ref[0]          # C1*x + C0 (no separate b2 splat)
    hidden = r_ref.shape[0]                # static (10) -> fully unrolled
    for k in range(hidden):
        acc = acc + r_ref[k] * jnp.abs(x + t_ref[k])  # 4 VPU ops / unit
    o_ref[...] = acc


def _precompute(w1, b1, w2, b2):
    """Fold the two Linear layers + ReLU into (C0, C1, r[k], t[k])."""
    w1 = w1.reshape(-1).astype(jnp.float32)
    b1 = b1.reshape(-1).astype(jnp.float32)
    w2 = w2.reshape(-1).astype(jnp.float32)
    b2 = b2.reshape(-1).astype(jnp.float32)

    nz = w1 != 0.0
    half_w2 = 0.5 * w2
    c1 = jnp.sum(w1 * half_w2)
    # Units with w1[k]==0 contribute the constant w2[k]*relu(b1[k]).
    c0 = b2[0] + jnp.sum(jnp.where(nz, b1 * half_w2, w2 * jnp.maximum(b1, 0.0)))
    r = jnp.where(nz, jnp.abs(w1) * half_w2, 0.0)
    t = jnp.where(nz, b1 / jnp.where(nz, w1, 1.0), 0.0)
    c = jnp.stack([c0, c1])
    return r, t, c


def mlp_forward(x, w1, b1, w2, b2, *, tile_rows=4096):
    """x: (B, 1). w1, b1, w2: (10,). b2: (1,). Returns (B, 1)."""
    B = x.shape[0]
    r, t, c = _precompute(w1, b1, w2, b2)

    xf = x.reshape(-1).astype(jnp.float32)

    # Lane-dense layout: batch -> (rows, 128).
    rows = pl.cdiv(max(B, 1), LANE)
    # Cap tr so the grid has >=2 steps at large B (work for both v7x TCs),
    # keep sublane (8) alignment, and never exceed tile_rows.
    tr = min(tile_rows, _round_up(pl.cdiv(rows, 2), 8))
    tr = max(tr, 8)
    rows_p = _round_up(rows, tr)
    total = rows_p * LANE

    padded = total != B
    if padded:
        xf = jnp.pad(xf, (0, total - B))   # only the ragged-tail case pays this
    x2 = xf.reshape(rows_p, LANE)

    smem = pl.BlockSpec(memory_space=pltpu.MemorySpace.SMEM)
    out2 = pl.pallas_call(
        mlp_kernel,
        out_shape=jax.ShapeDtypeStruct((rows_p, LANE), jnp.float32),
        grid=(rows_p // tr,),
        in_specs=[
            pl.BlockSpec((tr, LANE), lambda i: (i, 0)),  # x batch tiles
            smem,  # r
            smem,  # t
            smem,  # c = (C0, C1)
        ],
        out_specs=pl.BlockSpec((tr, LANE), lambda i: (i, 0)),
        compiler_params=pltpu.CompilerParams(
            dimension_semantics=("parallel",),  # shard batch tiles across TCs
        ),
    )(x2, r, t, c)

    outf = out2.reshape(-1)
    if padded:
        outf = outf[:B]
    return outf.reshape(B, 1).astype(x.dtype)


if __name__ == "__main__":
    key = jax.random.PRNGKey(0)
    k_x, k_w1, k_b1, k_w2, k_b2 = jax.random.split(key, 5)

    B = 8  # small batch consistent with the module; kernel scales to large B
    x = jax.random.normal(k_x, (B, 1), dtype=jnp.float32)
    # torch Linear(1,10): weight (10,1) -> flattened (10,); bias (10,)
    w1 = jax.random.normal(k_w1, (10,), dtype=jnp.float32) * 0.5
    b1 = jax.random.normal(k_b1, (10,), dtype=jnp.float32) * 0.1
    # torch Linear(10,1): weight (1,10) -> flattened (10,); bias (1,)
    w2 = jax.random.normal(k_w2, (10,), dtype=jnp.float32) * 0.5
    b2 = jax.random.normal(k_b2, (1,), dtype=jnp.float32) * 0.1

    out = mlp_forward(x, w1, b1, w2, b2)
    jax.block_until_ready(out)

    # Pure-JAX reference with torch Linear semantics.
    ref = jnp.maximum(x * w1[None, :] + b1[None, :], 0.0) @ w2[:, None] + b2[None, :]
    assert out.shape == (B, 1)
    assert jnp.allclose(out, ref, atol=1e-4, rtol=1e-4), "mismatch vs reference"

    print("KERNEL_OK")
</pallas_src>

<mosaic_0001>
module attributes {stable_mosaic.version = 11 : i64} {
  func.func @mlp_kernel(%arg0: i32, %arg1: memref<8x128xf32, #tpu.memory_space<vmem>>, %arg2: memref<10xf32, #tpu.memory_space<smem>>, %arg3: memref<10xf32, #tpu.memory_space<smem>>, %arg4: memref<2xf32, #tpu.memory_space<smem>>, %arg5: memref<8x128xf32, #tpu.memory_space<vmem>>) attributes {dimension_semantics = [#tpu.dimension_semantics<parallel>], iteration_bounds = array<i64: 1>, scalar_prefetch = 0 : i64, scratch_operands = 0 : i64, tpu.core_type = #tpu.core_type<tc>, window_params = [{transform_indices = @transform_0, window_bounds = array<i64: 8, 128>}, {transform_indices = @transform_1, window_bounds = array<i64: 10>}, {transform_indices = @transform_2, window_bounds = array<i64: 10>}, {transform_indices = @transform_3, window_bounds = array<i64: 2>}, {transform_indices = @transform_4, window_bounds = array<i64: 8, 128>}]} {
    %c0 = arith.constant 0 : index
    %c0_0 = arith.constant 0 : index
    %0 = vector.load %arg1[%c0, %c0_0] : memref<8x128xf32, #tpu.memory_space<vmem>>, vector<8x128xf32>
    %c1 = arith.constant 1 : index
    %1 = memref.load %arg4[%c1] : memref<2xf32, #tpu.memory_space<smem>>
    %2 = vector.broadcast %1 : f32 to vector<8x128xf32>
    %3 = arith.mulf %0, %2 : vector<8x128xf32>
    %c0_1 = arith.constant 0 : index
    %4 = memref.load %arg4[%c0_1] : memref<2xf32, #tpu.memory_space<smem>>
    %5 = vector.broadcast %4 : f32 to vector<8x128xf32>
    %6 = arith.addf %3, %5 : vector<8x128xf32>
    %c0_2 = arith.constant 0 : index
    %7 = memref.load %arg2[%c0_2] : memref<10xf32, #tpu.memory_space<smem>>
    %c0_3 = arith.constant 0 : index
    %8 = memref.load %arg3[%c0_3] : memref<10xf32, #tpu.memory_space<smem>>
    %9 = vector.broadcast %8 : f32 to vector<8x128xf32>
    %10 = arith.addf %0, %9 : vector<8x128xf32>
    %11 = math.absf %10 : vector<8x128xf32>
    %12 = vector.broadcast %7 : f32 to vector<8x128xf32>
    %13 = arith.mulf %12, %11 : vector<8x128xf32>
    %14 = arith.addf %6, %13 : vector<8x128xf32>
    %c1_4 = arith.constant 1 : index
    %15 = memref.load %arg2[%c1_4] : memref<10xf32, #tpu.memory_space<smem>>
    %c1_5 = arith.constant 1 : index
    %16 = memref.load %arg3[%c1_5] : memref<10xf32, #tpu.memory_space<smem>>
    %17 = vector.broadcast %16 : f32 to vector<8x128xf32>
    %18 = arith.addf %0, %17 : vector<8x128xf32>
    %19 = math.absf %18 : vector<8x128xf32>
    %20 = vector.broadcast %15 : f32 to vector<8x128xf32>
    %21 = arith.mulf %20, %19 : vector<8x128xf32>
    %22 = arith.addf %14, %21 : vector<8x128xf32>
    %c2 = arith.constant 2 : index
    %23 = memref.load %arg2[%c2] : memref<10xf32, #tpu.memory_space<smem>>
    %c2_6 = arith.constant 2 : index
    %24 = memref.load %arg3[%c2_6] : memref<10xf32, #tpu.memory_space<smem>>
    %25 = vector.broadcast %24 : f32 to vector<8x128xf32>
    %26 = arith.addf %0, %25 : vector<8x128xf32>
    %27 = math.absf %26 : vector<8x128xf32>
    %28 = vector.broadcast %23 : f32 to vector<8x128xf32>
    %29 = arith.mulf %28, %27 : vector<8x128xf32>
    %30 = arith.addf %22, %29 : vector<8x128xf32>
    %c3 = arith.constant 3 : index
    %31 = memref.load %arg2[%c3] : memref<10xf32, #tpu.memory_space<smem>>
    %c3_7 = arith.constant 3 : index
    %32 = memref.load %arg3[%c3_7] : memref<10xf32, #tpu.memory_space<smem>>
    %33 = vector.broadcast %32 : f32 to vector<8x128xf32>
    %34 = arith.addf %0, %33 : vector<8x128xf32>
    %35 = math.absf %34 : vector<8x128xf32>
    %36 = vector.broadcast %31 : f32 to vector<8x128xf32>
    %37 = arith.mulf %36, %35 : vector<8x128xf32>
    %38 = arith.addf %30, %37 : vector<8x128xf32>
    %c4 = arith.constant 4 : index
    %39 = memref.load %arg2[%c4] : memref<10xf32, #tpu.memory_space<smem>>
    %c4_8 = arith.constant 4 : index
    %40 = memref.load %arg3[%c4_8] : memref<10xf32, #tpu.memory_space<smem>>
    %41 = vector.broadcast %40 : f32 to vector<8x128xf32>
    %42 = arith.addf %0, %41 : vector<8x128xf32>
    %43 = math.absf %42 : vector<8x128xf32>
    %44 = vector.broadcast %39 : f32 to vector<8x128xf32>
    %45 = arith.mulf %44, %43 : vector<8x128xf32>
    %46 = arith.addf %38, %45 : vector<8x128xf32>
    %c5 = arith.constant 5 : index
    %47 = memref.load %arg2[%c5] : memref<10xf32, #tpu.memory_space<smem>>
    %c5_9 = arith.constant 5 : index
    %48 = memref.load %arg3[%c5_9] : memref<10xf32, #tpu.memory_space<smem>>
    %49 = vector.broadcast %48 : f32 to vector<8x128xf32>
    %50 = arith.addf %0, %49 : vector<8x128xf32>
    %51 = math.absf %50 : vector<8x128xf32>
    %52 = vector.broadcast %47 : f32 to vector<8x128xf32>
    %53 = arith.mulf %52, %51 : vector<8x128xf32>
    %54 = arith.addf %46, %53 : vector<8x128xf32>
    %c6 = arith.constant 6 : index
    %55 = memref.load %arg2[%c6] : memref<10xf32, #tpu.memory_space<smem>>
    %c6_10 = arith.constant 6 : index
    %56 = memref.load %arg3[%c6_10] : memref<10xf32, #tpu.memory_space<smem>>
    %57 = vector.broadcast %56 : f32 to vector<8x128xf32>
    %58 = arith.addf %0, %57 : vector<8x128xf32>
    %59 = math.absf %58 : vector<8x128xf32>
    %60 = vector.broadcast %55 : f32 to vector<8x128xf32>
    %61 = arith.mulf %60, %59 : vector<8x128xf32>
    %62 = arith.addf %54, %61 : vector<8x128xf32>
    %c7 = arith.constant 7 : index
    %63 = memref.load %arg2[%c7] : memref<10xf32, #tpu.memory_space<smem>>
    %c7_11 = arith.constant 7 : index
    %64 = memref.load %arg3[%c7_11] : memref<10xf32, #tpu.memory_space<smem>>
    %65 = vector.broadcast %64 : f32 to vector<8x128xf32>
    %66 = arith.addf %0, %65 : vector<8x128xf32>
    %67 = math.absf %66 : vector<8x128xf32>
    %68 = vector.broadcast %63 : f32 to vector<8x128xf32>
    %69 = arith.mulf %68, %67 : vector<8x128xf32>
    %70 = arith.addf %62, %69 : vector<8x128xf32>
    %c8 = arith.constant 8 : index
    %71 = memref.load %arg2[%c8] : memref<10xf32, #tpu.memory_space<smem>>
    %c8_12 = arith.constant 8 : index
    %72 = memref.load %arg3[%c8_12] : memref<10xf32, #tpu.memory_space<smem>>
    %73 = vector.broadcast %72 : f32 to vector<8x128xf32>
    %74 = arith.addf %0, %73 : vector<8x128xf32>
    %75 = math.absf %74 : vector<8x128xf32>
    %76 = vector.broadcast %71 : f32 to vector<8x128xf32>
    %77 = arith.mulf %76, %75 : vector<8x128xf32>
    %78 = arith.addf %70, %77 : vector<8x128xf32>
    %c9 = arith.constant 9 : index
    %79 = memref.load %arg2[%c9] : memref<10xf32, #tpu.memory_space<smem>>
    %c9_13 = arith.constant 9 : index
    %80 = memref.load %arg3[%c9_13] : memref<10xf32, #tpu.memory_space<smem>>
    %81 = vector.broadcast %80 : f32 to vector<8x128xf32>
    %82 = arith.addf %0, %81 : vector<8x128xf32>
    %83 = math.absf %82 : vector<8x128xf32>
    %84 = vector.broadcast %79 : f32 to vector<8x128xf32>
    %85 = arith.mulf %84, %83 : vector<8x128xf32>
    %86 = arith.addf %78, %85 : vector<8x128xf32>
    %c0_14 = arith.constant 0 : index
    %c0_15 = arith.constant 0 : index
    %87 = vector.load %arg5[%c0_14, %c0_15] : memref<8x128xf32, #tpu.memory_space<vmem>>, vector<8x128xf32>
    tpu.vector_store %arg5[%c0_14, %c0_15], %86 {strides = array<i32>} : memref<8x128xf32, #tpu.memory_space<vmem>>, vector<8x128xf32>,
    return
  }
  func.func @transform_0(%arg0: i32) -> (i32, i32) {
    %c0_i32 = arith.constant 0 : i32
    %c0_i32_0 = arith.constant 0 : i32
    return %arg0, %c0_i32 : i32, i32
  }
  func.func @transform_1(%arg0: i32) -> i32 {
    %c0_i32 = arith.constant 0 : i32
    %c0_i32_0 = arith.constant 0 : i32
    return %c0_i32 : i32
  }
  func.func @transform_2(%arg0: i32) -> i32 {
    %c0_i32 = arith.constant 0 : i32
    %c0_i32_0 = arith.constant 0 : i32
    return %c0_i32 : i32
  }
  func.func @transform_3(%arg0: i32) -> i32 {
    %c0_i32 = arith.constant 0 : i32
    %c0_i32_0 = arith.constant 0 : i32
    return %c0_i32 : i32
  }
  func.func @transform_4(%arg0: i32) -> (i32, i32) {
    %c0_i32 = arith.constant 0 : i32
    %c0_i32_0 = arith.constant 0 : i32
    return %arg0, %c0_i32 : i32, i32
  }
}

</mosaic_0001>

<bundles_post_ra>
// kernel: tpu_custom_call.1
= control target key start
LH: loop header
LB: loop body
LE: loop exit
PB: predicated region body
PF: predicated region fallthrough
CT: control target
= control target key end

     0   :  { %9 = vsyncpa [#allocation3], 0  ;;  %s364_s0 = inlined_call_operand.hbm [shape: f32[8,128], index: 0, kind: input, shape index: {}]   ;;  %s365_s1 = inlined_call_operand.vmem [shape: f32[10], index: 1, kind: input, shape index: {}]   ;;  %s366_s2 = inlined_call_operand.vmem [shape: f32[10], index: 2, kind: input, shape index: {}]   ;;  %s367_s3 = inlined_call_operand.vmem [shape: f32[2], index: 3, kind: input, shape index: {}]   ;;  %s368_s4 = inlined_call_operand.hbm [shape: f32[8,128], index: 4, kind: output, shape index: {}]  }
   0x1   :  { %10 = vsyncpa [#allocation5], 0 }
   0x2   :  { %11 = vsyncpa [#allocation8], 0  ;;  %s39_s17 = sshll.u32 %s366_s2, 4  ;;  %s40_s17 = int_to_ptr.vmem [resolvable:$true] %s39_s17 }
   0x3   :  { %12 = vsyncpa [#allocation4], 0  ;;  %s195_s18 = scalar_lea.vmem %s40_s17, 16  ;;  %p200_p1 = scmp.lt.s32.totalorder %s40_s17, %s40_s17 }
   0x4   :  { %p196_p0 = scmp.ne.s32.totalorder %s40_s17, %s195_s18  ;;  %p201_p2 = scmp.lt.s32.totalorder %s195_s18, %s195_s18 }
   0x6   :  { %p202_p3 = por %p201_p2, %p200_p1 }
   0x8   :  { %p203_p4 = pnand %p202_p3, %p196_p0 }
   0xa   :  { %206 = shalt.err (!%p203_p4)
}
   0xb   :  { %s279_s19 = smov [#allocation7]   ;;  %s280_s20 = smov [#allocation2]  }
   0xc   :  { %42 = dma.vmem_to_smem %s40_s17, 16, %s279_s19, [#allocation8]  }
   0xd   :  { %s19_s21 = sshll.u32 %s280_s20, 4  ;;  %s29_s24 = sshll.u32 %s365_s1, 4  ;;  %s20_s21 = int_to_ptr.vmem [resolvable:$true] %s19_s21  ;;  %s30_s24 = int_to_ptr.vmem [resolvable:$true] %s29_s24 }
   0xe   :  { %s215_s2 = scalar_lea.vmem %s20_s21, 128  ;;  %p220_p6 = scmp.lt.s32.totalorder %s20_s21, %s20_s21 }
   0xf   :  { %p216_p5 = scmp.ne.s32.totalorder %s20_s21, %s215_s2  ;;  %p221_p7 = scmp.lt.s32.totalorder %s215_s2, %s215_s2 }
  0x11   :  { %p222_p8 = por %p221_p7, %p220_p6 }
  0x13   :  { %p223_p9 = pnand %p222_p8, %p216_p5 }
  0x15   :  { %226 = shalt.err (!%p223_p9)
}
  0x16   :  { %22 = dma.hbm_to_vmem [thread:$0]  %s364_s0, 128, %s20_s21, [#allocation3]  }
  0x17   :  { %s49_s29 = sshll.u32 %s367_s3, 4  ;;  %s227_s30 = scalar_lea.vmem %s30_s24, 16  ;;  %s50_s29 = int_to_ptr.vmem [resolvable:$true] %s49_s29 }
  0x18   :  { %p228_p10 = scmp.ne.s32.totalorder %s30_s24, %s227_s30  ;;  %p232_p11 = scmp.lt.s32.totalorder %s30_s24, %s30_s24 }
  0x19   :  { %p233_p12 = scmp.lt.s32.totalorder %s227_s30, %s227_s30 }
  0x1b   :  { %p234_p13 = por %p233_p12, %p232_p11 }
  0x1d   :  { %p235_p0 = pnand %p234_p13, %p228_p10 }
  0x1f   :  { %238 = shalt.err (!%p235_p0)
}
  0x20   :  { %s281_s1 = smov [#allocation6]   ;;  %s239_s5 = scalar_lea.vmem %s50_s29, 16 }
  0x21   :  { %32 = dma.vmem_to_smem %s30_s24, 16, %s281_s1, [#allocation5]  }
  0x22   :  { %p240_p1 = scmp.ne.s32.totalorder %s50_s29, %s239_s5  ;;  %p244_p2 = scmp.lt.s32.totalorder %s50_s29, %s50_s29 }
  0x23   :  { %p245_p3 = scmp.lt.s32.totalorder %s239_s5, %s239_s5 }
  0x25   :  { %p246_p4 = por %p245_p3, %p244_p2 }
  0x27   :  { %p247_p5 = pnand %p246_p4, %p240_p1 }
  0x29   :  { %250 = shalt.err (!%p247_p5)
}
  0x2a   :  { %s282_s0 = smov [#allocation9]  }
  0x2b   :  { %52 = dma.vmem_to_smem %s50_s29, 16, %s282_s0, [#allocation8]  }
  0x2c   :  { %271 = dma.done.wait [#allocation3], 128  }
  0x2d   :  { %272 = vsyncadd [#allocation3], 4294967168 }
  0x2e   :  { %273 = dma.done.wait [#allocation5], 16  }
  0x2f   :  { %274 = vsyncadd [#allocation5], 4294967280 }
  0x30   :  { %275 = dma.done.wait [#allocation8], 32  }
  0x31   :  { %276 = vsyncadd [#allocation8], 4294967264 }
  0x32   :  { %65 = sfence }
  0x33   :  { %s171_s3 = sld [smem:[#allocation9 + $0x1]]  ;;  %v325_v1 = vld [vmem:[#allocation2] sm:$0xff]  ;;  %s283_s26 = smov [#allocation10]  }
  0x34   :  { %s70_s6 = sld [smem:[#allocation9]]  ;;  %s160_s27 = sshll.u32 %s283_s26, 4  ;;  %s161_s27 = int_to_ptr.vmem [resolvable:$true] %s160_s27 }
  0x35   :  { %s73_s7 = sld [smem:[#allocation6]]  ;;  %s251_s28 = scalar_lea.vmem %s161_s27, 128 }
  0x36   :  { %s74_s8 = sld [smem:[#allocation7]]  ;;  %p252_p6 = scmp.ne.s32.totalorder %s161_s27, %s251_s28 }
  0x37   :  { %s321_s9 = sld [smem:[#allocation6 + $0x1]]  ;;  %p256_p7 = scmp.lt.s32.totalorder %s161_s27, %s161_s27 }
  0x38   :  { %s173_s10 = sld [smem:[#allocation7 + $0x1]]  ;;  %p257_p8 = scmp.lt.s32.totalorder %s251_s28, %s251_s28 }
  0x39   :  { %v68_v0 = vstv %s171_s3  ;;  %s323_s11 = sld [smem:[#allocation6 + $0x2]] }
  0x3a   :  { %s175_s12 = sld [smem:[#allocation7 + $0x2]]  ;;  %v69_v2 = vmul.f32 %v68_v0, %v325_v1  ;;  %v71_v3 = vstv %s70_s6  ;;  %p258_p9 = por %p257_p8, %p256_p7 }
  0x3b   :  { %s328_s13 = sld [smem:[#allocation6 + $0x3]]  ;;  %v78_v6 = vstv %s73_s7 }
  0x3c   :  { %v75_v4 = vstv %s74_s8  ;;  %s177_s14 = sld [smem:[#allocation7 + $0x3]]  ;;  %v72_v8 = vadd.f32 %v71_v3, %v69_v2  ;;  %p259_p10 = pnand %p258_p9, %p252_p6 }
  0x3d   :  { %v76_v5 = vadd.f32 %v75_v4, %v325_v1  ;;  %s331_s15 = sld [smem:[#allocation6 + $0x4]]  ;;  %v86_v11 = vstv %s321_s9 }
  0x3e   :  { %v83_v7 = vstv %s173_s10  ;;  %s179_s16 = sld [smem:[#allocation7 + $0x4]] }
  0x3f   :  { %v77_v9 = vand.u32 2147483647, %v76_v5  ;;  %v84_v10 = vadd.f32 %v83_v7, %v325_v1  ;;  %s334_s17 = sld [smem:[#allocation6 + $0x5]]  ;;  %v94_v16 = vstv %s323_s11 }
  0x40   :  { %v91_v12 = vstv %s175_s12  ;;  %s181_s18 = sld [smem:[#allocation7 + $0x5]] }
  0x41   :  { %v79_v13 = vmul.f32 %v78_v6, %v77_v9  ;;  %v85_v14 = vand.u32 2147483647, %v84_v10  ;;  %v92_v15 = vadd.f32 %v91_v12, %v325_v1  ;;  %s338_s19 = sld [smem:[#allocation6 + $0x6]]  ;;  %v102_v22 = vstv %s328_s13 }
  0x42   :  { %v99_v17 = vstv %s177_s14  ;;  %s183_s20 = sld [smem:[#allocation7 + $0x6]] }
  0x43   :  { %v80_v18 = vadd.f32 %v79_v13, %v72_v8  ;;  %v87_v19 = vmul.f32 %v86_v11, %v85_v14  ;;  %v93_v20 = vand.u32 2147483647, %v92_v15  ;;  %v100_v21 = vadd.f32 %v99_v17, %v325_v1  ;;  %s342_s21 = sld [smem:[#allocation6 + $0x7]] }
  0x44   :  { %v107_v23 = vstv %s179_s16  ;;  %s185_s22 = sld [smem:[#allocation7 + $0x7]]  ;;  %v110_v28 = vstv %s331_s15 }
  0x45   :  { %v88_v24 = vadd.f32 %v87_v19, %v80_v18  ;;  %v95_v25 = vmul.f32 %v94_v16, %v93_v20  ;;  %v101_v26 = vand.u32 2147483647, %v100_v21  ;;  %v108_v27 = vadd.f32 %v107_v23, %v325_v1  ;;  %s346_s23 = sld [smem:[#allocation6 + $0x8]] }
  0x46   :  { %v115_v29 = vstv %s181_s18  ;;  %s187_s24 = sld [smem:[#allocation7 + $0x8]]  ;;  %v118_v34 = vstv %s334_s17 }
  0x47   :  { %v96_v30 = vadd.f32 %v95_v25, %v88_v24  ;;  %v103_v31 = vmul.f32 %v102_v22, %v101_v26  ;;  %v109_v32 = vand.u32 2147483647, %v108_v27  ;;  %v116_v33 = vadd.f32 %v115_v29, %v325_v1  ;;  %s350_s2 = sld [smem:[#allocation6 + $0x9]] }
  0x48   :  { %v123_v35 = vstv %s183_s20  ;;  %s189_s25 = sld [smem:[#allocation7 + $0x9]]  ;;  %v126_v40 = vstv %s338_s19 }
  0x49   :  { %v104_v36 = vadd.f32 %v103_v31, %v96_v30  ;;  %v111_v37 = vmul.f32 %v110_v28, %v109_v32  ;;  %v117_v38 = vand.u32 2147483647, %v116_v33  ;;  %v124_v39 = vadd.f32 %v123_v35, %v325_v1 }
  0x4a   :  { %v131_v41 = vstv %s185_s22  ;;  %v134_v46 = vstv %s342_s21 }
  0x4b   :  { %v112_v42 = vadd.f32 %v111_v37, %v104_v36  ;;  %v119_v43 = vmul.f32 %v118_v34, %v117_v38  ;;  %v125_v44 = vand.u32 2147483647, %v124_v39  ;;  %v132_v45 = vadd.f32 %v131_v41, %v325_v1 }
  0x4c   :  { %v139_v47 = vstv %s187_s24  ;;  %v142_v52 = vstv %s346_s23 }
  0x4d   :  { %v120_v48 = vadd.f32 %v119_v43, %v112_v42  ;;  %v127_v49 = vmul.f32 %v126_v40, %v125_v44  ;;  %v133_v50 = vand.u32 2147483647, %v132_v45  ;;  %v140_v51 = vadd.f32 %v139_v47, %v325_v1 }
  0x4e   :  { %v147_v53 = vstv %s189_s25  ;;  %v150_v58 = vstv %s350_s2 }
  0x4f   :  { %v128_v54 = vadd.f32 %v127_v49, %v120_v48  ;;  %v135_v55 = vmul.f32 %v134_v46, %v133_v50  ;;  %v141_v56 = vand.u32 2147483647, %v140_v51  ;;  %v148_v57 = vadd.f32 %v147_v53, %v325_v1 }
  0x51   :  { %v136_v59 = vadd.f32 %v135_v55, %v128_v54  ;;  %v143_v60 = vmul.f32 %v142_v52, %v141_v56  ;;  %v149_v61 = vand.u32 2147483647, %v148_v57 }
  0x53   :  { %v144_v62 = vadd.f32 %v143_v60, %v136_v59  ;;  %v151_v63 = vmul.f32 %v150_v58, %v149_v61 }
  0x55   :  { %v152_v0 = vadd.f32 %v151_v63, %v144_v62 }
  0x57   :  { %153 = vst [vmem:[#allocation10] sm:$0xff] %v152_v0 }
  0x58   :  { %262 = shalt.err (!%p259_p10)
}
  0x59   :  { %163 = dma.vmem_to_hbm [thread:$0]  %s161_s27, 128, %s368_s4, [#allocation4]  }
  0x5a   :  { %277 = dma.done.wait [#allocation4], 128  }
  0x5b   :  { %278 = vsyncadd [#allocation4], 4294967168 }
  0x5c   :  { %167 = vsyncpa [#allocation3], 1 }
  0x5d   :  { %168 = vsyncpa [#allocation4], 1 }
  0x5e   :  { %169 = vsyncpa [#allocation5], 1 }
  0x5f   :  { %170 = vsyncpa [#allocation8], 1 }

</bundles_post_ra>
